<compile_context>
chip_gen: v6e
topology: v6e:2x2x1
jax: 0.10.0
libtpu: 0.0.40
codegen_flags: <defaults>
</compile_context>

<pallas_src>
import math

import jax
import jax.numpy as jnp
from jax.experimental import pallas as pl
from jax.experimental.pallas import tpu as pltpu

N_ACTION = 3  # ALE/Freeway action space size

_TB_HARD_CAP = 65536          # lane-tile cap; safe with vmem_limit_bytes=32 MiB
_VMEM_LIMIT = 32 * 1024 * 1024


def _round_up(n, m):
    return ((n + m - 1) // m) * m


def dqn_mlp_kernel(x_ref, w1_ref, b1_ref, w2_ref, b2_ref, w3_ref, b3_ref, o_ref):
    # x_ref: (in_dim, TB) feature-major; may be uint8 RAM bytes (converted here).
    # The 1/255 input normalization is folded into w1 by the wrapper.
    x = x_ref[...].astype(jnp.float32)

    h1 = jnp.dot(w1_ref[...], x, preferred_element_type=jnp.float32) + b1_ref[...]
    h1 = jnp.maximum(h1, 0.0)

    h2 = jnp.dot(w2_ref[...], h1, preferred_element_type=jnp.float32) + b2_ref[...]
    h2 = jnp.maximum(h2, 0.0)

    out = jnp.dot(w3_ref[...], h2, preferred_element_type=jnp.float32) + b3_ref[...]
    o_ref[...] = out.astype(o_ref.dtype)


def dqn_forward(x, params, *, block_batch=32768, feature_major=False):
    """Forward pass of the dqn MLP.

    x: (B, 12) batch-major (any dtype, incl. uint8 RAM bytes), or (12, B) with
       feature_major=True (skips the wrapper-side transpose entirely).
    params: PyTorch-layout weights w_i (out, in), biases b_i (out,).
    Returns (B, n_action) float32.
    """
    in_dim = params["w1"].shape[1]
    h1_dim = params["w1"].shape[0]
    h2_dim = params["w2"].shape[0]
    n_action = params["w3"].shape[0]

    if feature_major:
        assert x.shape[0] == in_dim, x.shape
        xT = x
        B = x.shape[1]
    else:
        assert x.shape[1] == in_dim, x.shape
        B = x.shape[0]
        # Layout plumbing only: with uint8 bytes this is 24 B/sample of HBM
        # traffic.  Producers holding (12, B) should pass feature_major=True.
        xT = x.T

    # Lane tile over the batch: multiple of 128, capped for VMEM.
    b128 = _round_up(B, 128)
    tb = min(block_batch, _TB_HARD_CAP, b128)
    tb = max(128, (tb // 128) * 128)
    # v7x has 2 TensorCores: keep >= 2 grid steps on the "parallel" batch axis
    # whenever the batch is big enough to split, so both cores issue DMAs.
    if b128 >= 2 * 128 and pl.cdiv(B, tb) < 2:
        tb = max(128, _round_up(pl.cdiv(b128, 2), 128))
    num_tiles = pl.cdiv(B, tb)  # ragged tail block handled by Pallas masking

    # Fold the 1/255 normalization into the first-layer weight; biases become
    # (out, 1) columns so they broadcast along the lane (batch) axis.
    w1s = (params["w1"] * (1.0 / 255.0)).astype(jnp.float32)
    b1 = params["b1"].astype(jnp.float32).reshape(-1, 1)
    w2 = params["w2"].astype(jnp.float32)
    b2 = params["b2"].astype(jnp.float32).reshape(-1, 1)
    w3 = params["w3"].astype(jnp.float32)
    b3 = params["b3"].astype(jnp.float32).reshape(-1, 1)

    def resident(shape):
        # Same block every grid step -> stays VMEM-resident, no per-tile re-DMA.
        return pl.BlockSpec(shape, lambda i: (0, 0))

    flops = 2 * B * (in_dim * h1_dim + h1_dim * h2_dim + h2_dim * n_action)
    param_bytes = 4 * (w1s.size + b1.size + w2.size + b2.size + w3.size + b3.size)
    x_bytes = jnp.dtype(xT.dtype).itemsize * in_dim * B
    bytes_accessed = x_bytes + 4 * n_action * B + param_bytes

    outT = pl.pallas_call(
        dqn_mlp_kernel,
        out_shape=jax.ShapeDtypeStruct((n_action, B), jnp.float32),
        grid=(num_tiles,),
        in_specs=[
            pl.BlockSpec((in_dim, tb), lambda i: (0, i)),  # lane-dense batch tile
            resident((h1_dim, in_dim)),
            resident((h1_dim, 1)),
            resident((h2_dim, h1_dim)),
            resident((h2_dim, 1)),
            resident((n_action, h2_dim)),
            resident((n_action, 1)),
        ],
        out_specs=pl.BlockSpec((n_action, tb), lambda i: (0, i)),
        compiler_params=pltpu.CompilerParams(
            dimension_semantics=("parallel",),
            vmem_limit_bytes=_VMEM_LIMIT),
        cost_estimate=pl.CostEstimate(
            flops=flops, transcendentals=0, bytes_accessed=int(bytes_accessed)),
    )(xT, w1s, b1, w2, b2, w3, b3)

    return outT.T  # (B, n_action)


def init_params(key, n_action=N_ACTION):
    """Deterministic init mimicking PyTorch nn.Linear defaults:
    U(-1/sqrt(fan_in), 1/sqrt(fan_in)); weights stored (out, in), biases (out,)."""
    dims = [(12, 8), (8, 4), (4, n_action)]
    params = {}
    keys = jax.random.split(key, 2 * len(dims))
    for i, (fan_in, fan_out) in enumerate(dims):
        bound = 1.0 / math.sqrt(fan_in)
        params[f"w{i + 1}"] = jax.random.uniform(
            keys[2 * i], (fan_out, fan_in), jnp.float32, -bound, bound)
        params[f"b{i + 1}"] = jax.random.uniform(
            keys[2 * i + 1], (fan_out,), jnp.float32, -bound, bound)
    return params


def dqn_reference(x, params):
    """Pure-JAX reference of the PyTorch forward pass (for sanity check)."""
    h = x / 255.0
    h = jnp.maximum(h @ params["w1"].T + params["b1"], 0.0)
    h = jnp.maximum(h @ params["w2"].T + params["b2"], 0.0)
    return h @ params["w3"].T + params["b3"]


if __name__ == "__main__":
    key = jax.random.PRNGKey(0)
    k_params, k_x = jax.random.split(key)

    params = init_params(k_params, n_action=N_ACTION)

    # 1) Small batch of uint8 RAM bytes (u8 end-to-end; astype happens in-kernel).
    batch = 4
    x_u8 = jax.random.randint(k_x, (batch, 12), 0, 256, dtype=jnp.int32).astype(jnp.uint8)
    out = jax.block_until_ready(dqn_forward(x_u8, params))
    ref = dqn_reference(x_u8.astype(jnp.float32), params)
    assert out.shape == (batch, N_ACTION), out.shape
    assert jnp.allclose(out, ref, atol=1e-4, rtol=1e-4), (out, ref)

    # 2) Multi-tile + ragged tail: B=300 with 128-lane tiles -> grid of 3,
    #    last block masked (no padding is materialized anywhere).
    batch2 = 300
    x2_u8 = jax.random.randint(jax.random.PRNGKey(1), (batch2, 12), 0, 256,
                               dtype=jnp.int32).astype(jnp.uint8)
    out2 = jax.block_until_ready(dqn_forward(x2_u8, params, block_batch=128))
    ref2 = dqn_reference(x2_u8.astype(jnp.float32), params)
    assert out2.shape == (batch2, N_ACTION), out2.shape
    assert jnp.allclose(out2, ref2, atol=1e-4, rtol=1e-4)

    # 3) Feature-major f32 producer path (no wrapper transpose) + the ">=2 grid
    #    steps" split path (B=257 -> two 256-lane tiles, tail masked).
    batch3 = 257
    x3T = jax.random.uniform(jax.random.PRNGKey(2), (12, batch3), jnp.float32, 0.0, 255.0)
    out3 = jax.block_until_ready(dqn_forward(x3T, params, feature_major=True))
    ref3 = dqn_reference(x3T.T, params)
    assert out3.shape == (batch3, N_ACTION), out3.shape
    assert jnp.allclose(out3, ref3, atol=1e-4, rtol=1e-4)

    print("KERNEL_OK")
</pallas_src>

<mosaic_0001>
module attributes {stable_mosaic.version = 11 : i64} {
  func.func @dqn_mlp_kernel(%arg0: i32, %arg1: memref<12x128xi8, #tpu.memory_space<vmem>>, %arg2: memref<8x12xf32, #tpu.memory_space<vmem>>, %arg3: memref<8x1xf32, #tpu.memory_space<vmem>>, %arg4: memref<4x8xf32, #tpu.memory_space<vmem>>, %arg5: memref<4x1xf32, #tpu.memory_space<vmem>>, %arg6: memref<3x4xf32, #tpu.memory_space<vmem>>, %arg7: memref<3x1xf32, #tpu.memory_space<vmem>>, %arg8: memref<3x128xf32, #tpu.memory_space<vmem>>) attributes {dimension_semantics = [#tpu.dimension_semantics<parallel>], iteration_bounds = array<i64: 1>, scalar_prefetch = 0 : i64, scratch_operands = 0 : i64, tpu.core_type = #tpu.core_type<tc>, window_params = [{transform_indices = @transform_0, window_bounds = array<i64: 12, 128>}, {pipeline_mode = #tpu.pipeline_mode<synchronous>, transform_indices = @transform_1, window_bounds = array<i64: 8, 12>}, {pipeline_mode = #tpu.pipeline_mode<synchronous>, transform_indices = @transform_2, window_bounds = array<i64: 8, 1>}, {pipeline_mode = #tpu.pipeline_mode<synchronous>, transform_indices = @transform_3, window_bounds = array<i64: 4, 8>}, {pipeline_mode = #tpu.pipeline_mode<synchronous>, transform_indices = @transform_4, window_bounds = array<i64: 4, 1>}, {pipeline_mode = #tpu.pipeline_mode<synchronous>, transform_indices = @transform_5, window_bounds = array<i64: 3, 4>}, {pipeline_mode = #tpu.pipeline_mode<synchronous>, transform_indices = @transform_6, window_bounds = array<i64: 3, 1>}, {transform_indices = @transform_7, window_bounds = array<i64: 3, 128>}]} {
    %c0 = arith.constant 0 : index
    %c0_0 = arith.constant 0 : index
    %0 = vector.load %arg1[%c0, %c0_0] : memref<12x128xi8, #tpu.memory_space<vmem>>, vector<12x128xi8>
    %1 = arith.uitofp %0 : vector<12x128xi8> to vector<12x128xf32>
    %c0_1 = arith.constant 0 : index
    %c0_2 = arith.constant 0 : index
    %2 = vector.load %arg2[%c0_1, %c0_2] : memref<8x12xf32, #tpu.memory_space<vmem>>, vector<8x12xf32>
    %cst = arith.constant dense<0.000000e+00> : vector<8x128xf32>
    %3 = tpu.matmul %2, %1, %cst {dimension_numbers = #tpu.dot_dimension_numbers<[1], [0], [0], [1], [0, 0, 1, 1], [], []>} : vector<8x12xf32>, vector<12x128xf32>, vector<8x128xf32> -> vector<8x128xf32>
    %c0_3 = arith.constant 0 : index
    %c0_4 = arith.constant 0 : index
    %4 = vector.load %arg3[%c0_3, %c0_4] : memref<8x1xf32, #tpu.memory_space<vmem>>, vector<8x1xf32>
    %5 = vector.broadcast %4 : vector<8x1xf32> to vector<8x128xf32>
    %6 = arith.addf %3, %5 : vector<8x128xf32>
    %cst_5 = arith.constant 0.000000e+00 : f32
    %7 = vector.broadcast %cst_5 : f32 to vector<8x128xf32>
    %8 = arith.maximumf %6, %7 : vector<8x128xf32>
    %c0_6 = arith.constant 0 : index
    %c0_7 = arith.constant 0 : index
    %9 = vector.load %arg4[%c0_6, %c0_7] : memref<4x8xf32, #tpu.memory_space<vmem>>, vector<4x8xf32>
    %cst_8 = arith.constant dense<0.000000e+00> : vector<4x128xf32>
    %10 = tpu.matmul %9, %8, %cst_8 {dimension_numbers = #tpu.dot_dimension_numbers<[1], [0], [0], [1], [0, 0, 1, 1], [], []>} : vector<4x8xf32>, vector<8x128xf32>, vector<4x128xf32> -> vector<4x128xf32>
    %c0_9 = arith.constant 0 : index
    %c0_10 = arith.constant 0 : index
    %11 = vector.load %arg5[%c0_9, %c0_10] : memref<4x1xf32, #tpu.memory_space<vmem>>, vector<4x1xf32>
    %12 = vector.broadcast %11 : vector<4x1xf32> to vector<4x128xf32>
    %13 = arith.addf %10, %12 : vector<4x128xf32>
    %cst_11 = arith.constant 0.000000e+00 : f32
    %14 = vector.broadcast %cst_11 : f32 to vector<4x128xf32>
    %15 = arith.maximumf %13, %14 : vector<4x128xf32>
    %c0_12 = arith.constant 0 : index
    %c0_13 = arith.constant 0 : index
    %16 = vector.load %arg6[%c0_12, %c0_13] : memref<3x4xf32, #tpu.memory_space<vmem>>, vector<3x4xf32>
    %cst_14 = arith.constant dense<0.000000e+00> : vector<3x128xf32>
    %17 = tpu.matmul %16, %15, %cst_14 {dimension_numbers = #tpu.dot_dimension_numbers<[1], [0], [0], [1], [0, 0, 1, 1], [], []>} : vector<3x4xf32>, vector<4x128xf32>, vector<3x128xf32> -> vector<3x128xf32>
    %c0_15 = arith.constant 0 : index
    %c0_16 = arith.constant 0 : index
    %18 = vector.load %arg7[%c0_15, %c0_16] : memref<3x1xf32, #tpu.memory_space<vmem>>, vector<3x1xf32>
    %19 = vector.broadcast %18 : vector<3x1xf32> to vector<3x128xf32>
    %20 = arith.addf %17, %19 : vector<3x128xf32>
    %c0_17 = arith.constant 0 : index
    %c0_18 = arith.constant 0 : index
    %21 = vector.load %arg8[%c0_17, %c0_18] : memref<3x128xf32, #tpu.memory_space<vmem>>, vector<3x128xf32>
    tpu.vector_store %arg8[%c0_17, %c0_18], %20 {strides = array<i32>} : memref<3x128xf32, #tpu.memory_space<vmem>>, vector<3x128xf32>,
    return
  }
  func.func @transform_0(%arg0: i32) -> (i32, i32) {
    %c0_i32 = arith.constant 0 : i32
    %c0_i32_0 = arith.constant 0 : i32
    return %c0_i32, %arg0 : i32, i32
  }
  func.func @transform_1(%arg0: i32) -> (i32, i32) {
    %c0_i32 = arith.constant 0 : i32
    %c0_i32_0 = arith.constant 0 : i32
    %c0_i32_1 = arith.constant 0 : i32
    return %c0_i32, %c0_i32_0 : i32, i32
  }
  func.func @transform_2(%arg0: i32) -> (i32, i32) {
    %c0_i32 = arith.constant 0 : i32
    %c0_i32_0 = arith.constant 0 : i32
    %c0_i32_1 = arith.constant 0 : i32
    return %c0_i32, %c0_i32_0 : i32, i32
  }
  func.func @transform_3(%arg0: i32) -> (i32, i32) {
    %c0_i32 = arith.constant 0 : i32
    %c0_i32_0 = arith.constant 0 : i32
    %c0_i32_1 = arith.constant 0 : i32
    return %c0_i32, %c0_i32_0 : i32, i32
  }
  func.func @transform_4(%arg0: i32) -> (i32, i32) {
    %c0_i32 = arith.constant 0 : i32
    %c0_i32_0 = arith.constant 0 : i32
    %c0_i32_1 = arith.constant 0 : i32
    return %c0_i32, %c0_i32_0 : i32, i32
  }
  func.func @transform_5(%arg0: i32) -> (i32, i32) {
    %c0_i32 = arith.constant 0 : i32
    %c0_i32_0 = arith.constant 0 : i32
    %c0_i32_1 = arith.constant 0 : i32
    return %c0_i32, %c0_i32_0 : i32, i32
  }
  func.func @transform_6(%arg0: i32) -> (i32, i32) {
    %c0_i32 = arith.constant 0 : i32
    %c0_i32_0 = arith.constant 0 : i32
    %c0_i32_1 = arith.constant 0 : i32
    return %c0_i32, %c0_i32_0 : i32, i32
  }
  func.func @transform_7(%arg0: i32) -> (i32, i32) {
    %c0_i32 = arith.constant 0 : i32
    %c0_i32_0 = arith.constant 0 : i32
    return %c0_i32, %arg0 : i32, i32
  }
}

</mosaic_0001>

<bundles_post_ra>
// kernel: tpu_custom_call.1
= control target key start
LH: loop header
LB: loop body
LE: loop exit
PB: predicated region body
PF: predicated region fallthrough
CT: control target
= control target key end

     0   :  { %v359_v2 = vmov 0.0   ;;  %vm360_vm0 = vmmov 0   ;;  %s435_s0 = inlined_call_operand.vmem [shape: u8[12,4], index: 0, kind: input, shape index: {}]   ;;  %s436_s1 = inlined_call_operand.vmem [shape: f32[8,12], index: 1, kind: input, shape index: {}]   ;;  %s437_s2 = inlined_call_operand.vmem [shape: f32[8,1], index: 2, kind: input, shape index: {}]   ;;  %s438_s3 = inlined_call_operand.vmem [shape: f32[4,8], index: 3, kind: input, shape index: {}]   ;;  %s439_s4 = inlined_call_operand.vmem [shape: f32[4,1], index: 4, kind: input, shape index: {}]   ;;  %s440_s5 = inlined_call_operand.vmem [shape: f32[3,4], index: 5, kind: input, shape index: {}]   ;;  %s441_s6 = inlined_call_operand.vmem [shape: f32[3,1], index: 6, kind: input, shape index: {}]   ;;  %s442_s7 = inlined_call_operand.hbm [shape: f32[3,4], index: 7, kind: output, shape index: {}]  }
   0x1   :  { %v28_v0 = vld [vmem:[%s435_s0 + $0x2] sm:$0x1]  ;;  %v27_v1 = vld [vmem:[%s435_s0] sm:$0x3]  ;;  %314 = vmatprep.subr.mxu0 %v359_v2  ;;  %321 = vmatprep.subr.mxu1 %v359_v2 }
   0x2   :  { %v30_v3 = vunpack.c.0.s8 %v28_v0  ;;  %v29_v4 = vunpack.c.0.s8 %v27_v1  ;;  %v36_v5 = vld [vmem:[%s437_s2] sm:$0xff]  ;;  %318 = vmatprep.mubr.msk.f32.mxu0 %vm360_vm0, %v359_v2  ;;  %323 = vmatprep.mubr.msk.f32.mxu1 %vm360_vm0, %v359_v2 }
   0x3   :  { %12 = vsyncpa [#allocation3], 0  ;;  %v361_v8 = vmov 0   ;;  %vm46_vm1 = vcmask 1043456   ;;  %v122_v11 = vld [vmem:[%s439_s4] sm:$0xf] }
   0x4   :  { %v32_v6 = vand.u32 255, %v30_v3  ;;  %v31_v7 = vand.u32 255, %v29_v4  ;;  %335 = vset.pattern.permute.xlu0 %v361_v8  ;;  %336 = vset.pattern.permute.xlu1 %v361_v8  ;;  %v35_v12 = vld [vmem:[%s436_s1] sm:$0xff]  ;;  %vm42_vm2 = vcmask 97280   ;;  %vm128_vm3 = vcmask 64512  }
   0x5   :  { %39 = vperm.xlu0 %335, %v36_v5   ;;  %v121_v18 = vld [vmem:[%s438_s3] sm:$0xf]  ;;  %vm210_vm4 = vcmask 31744   ;;  %s362_s3 = smov [#allocation2]  }
   0x6   :  { %v34_v9 = vcvt.s32.f32 %v32_v6  ;;  %v33_v10 = vcvt.s32.f32 %v31_v7  ;;  %v204_v19 = vld [vmem:[%s441_s6] sm:$0x7]  ;;  %s294_s13 = sshll.u32 %s362_s3, 4  ;;  %s295_s13 = int_to_ptr.vmem [resolvable:$true] %s294_s13 }
   0x7   :  { %207 = vperm.xlu1 %336, %v204_v19   ;;  %v203_v25 = vld [vmem:[%s440_s5] sm:$0x7]  ;;  %s337_s6 = scalar_lea.vmem %s295_s13, 64  ;;  %p342_p1 = scmp.lt.s32.totalorder %s295_s13, %s295_s13 }
   0x8   :  { %315 = vmatpush3.msk.msra.mxu0 %vm46_vm1, %v34_v9  ;;  %p338_p0 = scmp.ne.s32.totalorder %s295_s13, %s337_s6  ;;  %p343_p2 = scmp.lt.s32.totalorder %s337_s6, %s337_s6 }
   0x9   :  { %316 = vmatprep.subr.mxu0 %v359_v2  ;;  %125 = vperm.xlu0 %335, %v122_v11  }
   0xa   :  { %317 = vmatpush3.msra.mxu0 %v33_v10  ;;  %p344_p3 = por %p343_p2, %p342_p1 }
   0xb   :  { %319 = vmatmul.mubr.msk.f32.vlgmr.msra.gmra.mxu0 %vm42_vm2, %v35_v12 }
   0xc   :  { %p345_p4 = pnand %p344_p3, %p338_p0 }
  0x80   :  { %v40_v13 = vpop.permute.xlu0 %39 }
  0x82   :  { %v208_v26 = vpop.permute.xlu1 %207 }
  0x84   :  { %v126_v20 = vpop.permute.xlu0 %125 }
  0xcb   :  { %v116_v14 = vpop.f32.mrf.mxu0 }
  0xcc   :  { %v117_v15 = vadd.f32 %v116_v14, %v40_v13 }
  0xcd   :  { %v320_v16 = vpop.f32.mrf.mxu0 }
  0xce   :  { %v120_v17 = vmax.f32 %v117_v15, 0.0 }
  0xd0   :  { %322 = vmatpush3.msra.mxu1 %v120_v17 }
  0xd1   :  { %324 = vmatmul.mubr.msk.f32.vlgmr.msra.gmra.mxu1 %vm128_vm3, %v121_v18  ;;  %326 = vmatprep.subr.mxu1 %v359_v2 }
  0xd2   :  { %328 = vmatprep.mubr.msk.f32.mxu1 %vm360_vm0, %v359_v2 }
 0x191   :  { %v198_v21 = vpop.f32.mrf.mxu1 }
 0x192   :  { %v199_v22 = vadd.f32 %v198_v21, %v126_v20 }
 0x193   :  { %v325_v23 = vpop.f32.mrf.mxu1 }
 0x194   :  { %v202_v24 = vmax.f32 %v199_v22, 0.0 }
 0x196   :  { %327 = vmatpush3.msk.msra.mxu1 %vm46_vm1, %v202_v24 }
 0x197   :  { %329 = vmatmul.mubr.msk.f32.vlgmr.msra.gmra.mxu1 %vm210_vm4, %v203_v25 }
 0x257   :  { %v283_v27 = vpop.f32.mrf.mxu1 }
 0x258   :  { %v284_v28 = vadd.f32 %v283_v27, %v208_v26 }
 0x259   :  { %v330_v29 = vpop.f32.mrf.mxu1 }
 0x25a   :  { %287 = vst [vmem:[#allocation2] sm:$0x7] %v284_v28 }
 0x25b   :  { %348 = shalt.err (!%p345_p4)
}
 0x25c   :  { %297 = dma.vmem_to_hbm [thread:$0]  %s295_s13, 64, %s442_s7, [#allocation3]  }
 0x25d   :  { %357 = dma.done.wait [#allocation3], 64  }
 0x25e   :  { %358 = vsyncadd [#allocation3], 4294967232 }
 0x25f   :  { %301 = vsyncpa [#allocation3], 1 }

</bundles_post_ra>
